<compile_context>
chip_gen: v7x
topology: tpu7x:2x2x1
jax: 0.10.0
libtpu: 0.0.40
codegen_flags: <defaults>
</compile_context>

<pallas_src>
import jax
import jax.numpy as jnp
from jax.experimental import pallas as pl
from jax.experimental.pallas import tpu as pltpu


K_PAD = 16    # input features padded 10 -> 16
N_PAD = 128   # final output padded 2 -> 128 (lane-dense stores)


def _mlp_kernel(x_ref,
                w1, b1, w2, b2, w3, b3, w4, b4, w5, b5, w6, b6,
                o_ref):
    # x_ref is bf16; every dot feeds bf16 operands to the MXU with f32 accumulation.
    def dense(h_bf16, w_ref, b_ref):
        return jnp.dot(h_bf16, w_ref[...],
                       preferred_element_type=jnp.float32) + b_ref[...]

    def relu_bf16(y_f32):
        # ReLU in f32 (v5e-friendly), cast to bf16 only for the next MXU pass.
        return jnp.maximum(y_f32, 0.0).astype(jnp.bfloat16)

    h = relu_bf16(dense(x_ref[...], w1, b1))
    h = relu_bf16(dense(h, w2, b2))
    h = relu_bf16(dense(h, w3, b3))
    h = relu_bf16(dense(h, w4, b4))
    h = relu_bf16(dense(h, w5, b5))
    o_ref[...] = dense(h, w6, b6).astype(o_ref.dtype)   # no ReLU on fc6


def _round_up(n, m):
    return ((n + m - 1) // m) * m


def memberinf_forward(x, params, *, tile_b=256):
    """x: (B, 10) float32; params: list of 6 (W (in,out) f32, b (1,out) f32) pairs."""
    B, f_in = x.shape
    assert f_in == 10 and len(params) == 6

    # --- wrapper-side layout plumbing: pad + cast ---
    # Keep the batch tile sublane-aligned and no larger than the (padded) batch.
    tile_b = max(8, min(tile_b, _round_up(B, 8)))
    b_pad = _round_up(B, tile_b)

    x_p = jnp.zeros((b_pad, K_PAD), jnp.bfloat16).at[:B, :f_in].set(
        x.astype(jnp.bfloat16))

    ws, bs = [], []
    for i, (w, b) in enumerate(params):
        k, n = w.shape
        k_t = K_PAD if i == 0 else k
        n_t = N_PAD if i == 5 else n
        w_p = jnp.zeros((k_t, n_t), jnp.bfloat16).at[:k, :n].set(w.astype(jnp.bfloat16))
        b_p = jnp.zeros((1, n_t), jnp.float32).at[:, :n].set(b.astype(jnp.float32))
        ws.append(w_p)
        bs.append(b_p)

    # --- specs: x/out tiled along batch, weights/biases VMEM-resident across grid steps ---
    in_specs = [pl.BlockSpec((tile_b, K_PAD), lambda i: (i, 0))]
    flat = []
    for w_p, b_p in zip(ws, bs):
        flat.extend([w_p, b_p])
        in_specs.append(pl.BlockSpec(w_p.shape, lambda i: (0, 0)))
        in_specs.append(pl.BlockSpec(b_p.shape, lambda i: (0, 0)))
    out_spec = pl.BlockSpec((tile_b, N_PAD), lambda i: (i, 0))

    flops = 2 * b_pad * sum(w.shape[0] * w.shape[1] for w in ws)
    bytes_accessed = (x_p.size * 2 + b_pad * N_PAD * 4
                      + sum(w.size * 2 for w in ws)
                      + sum(b.size * 4 for b in bs))

    out_pad = pl.pallas_call(
        _mlp_kernel,
        out_shape=jax.ShapeDtypeStruct((b_pad, N_PAD), jnp.float32),
        grid=(b_pad // tile_b,),
        in_specs=in_specs,
        out_specs=out_spec,
        compiler_params=pltpu.CompilerParams(
            dimension_semantics=("parallel",),
            vmem_limit_bytes=32 * 1024 * 1024,
        ),
        cost_estimate=pl.CostEstimate(
            flops=flops, transcendentals=0, bytes_accessed=bytes_accessed),
    )(x_p, *flat)

    # Strip batch padding and the lane padding of the final layer.
    return out_pad[:B, :2]


def init_params(key):
    """Deterministic init mimicking nn.Linear's U(-1/sqrt(fan_in), 1/sqrt(fan_in))."""
    dims = [10, 64, 128, 256, 128, 64, 2]
    params = []
    for i in range(6):
        fan_in, fan_out = dims[i], dims[i + 1]
        key, kw, kb = jax.random.split(key, 3)
        bound = 1.0 / (fan_in ** 0.5)
        # store weight as (in, out) so the kernel does x @ W  (nn.Linear weight transposed)
        w = jax.random.uniform(kw, (fan_in, fan_out), jnp.float32, -bound, bound)
        b = jax.random.uniform(kb, (1, fan_out), jnp.float32, -bound, bound)
        params.append((w, b))
    return params


def reference_forward(x, params):
    """Pure-JAX reference emulating the kernel's bf16-operand / f32-accumulate matmuls."""
    h = x
    for i, (w, b) in enumerate(params):
        h = jnp.dot(h.astype(jnp.bfloat16), w.astype(jnp.bfloat16),
                    preferred_element_type=jnp.float32) + b
        if i < 5:
            h = jnp.maximum(h, 0.0)
    return h


if __name__ == "__main__":
    key = jax.random.PRNGKey(0)
    kx, kp = jax.random.split(key)
    params = init_params(kp)
    x = jax.random.normal(kx, (8, 10), jnp.float32)   # batch=8, features=10

    out = memberinf_forward(x, params)
    out = jax.block_until_ready(out)

    ref = reference_forward(x, params)
    assert out.shape == (8, 2)
    assert jnp.allclose(out, ref, atol=1e-2, rtol=1e-2), (out, ref)
    print("KERNEL_OK")
</pallas_src>

<mosaic_0001>
module attributes {stable_mosaic.version = 11 : i64} {
  func.func @_mlp_kernel(%arg0: i32, %arg1: memref<8x16xbf16, #tpu.memory_space<vmem>>, %arg2: memref<16x64xbf16, #tpu.memory_space<vmem>>, %arg3: memref<1x64xf32, #tpu.memory_space<vmem>>, %arg4: memref<64x128xbf16, #tpu.memory_space<vmem>>, %arg5: memref<1x128xf32, #tpu.memory_space<vmem>>, %arg6: memref<128x256xbf16, #tpu.memory_space<vmem>>, %arg7: memref<1x256xf32, #tpu.memory_space<vmem>>, %arg8: memref<256x128xbf16, #tpu.memory_space<vmem>>, %arg9: memref<1x128xf32, #tpu.memory_space<vmem>>, %arg10: memref<128x64xbf16, #tpu.memory_space<vmem>>, %arg11: memref<1x64xf32, #tpu.memory_space<vmem>>, %arg12: memref<64x128xbf16, #tpu.memory_space<vmem>>, %arg13: memref<1x128xf32, #tpu.memory_space<vmem>>, %arg14: memref<8x128xf32, #tpu.memory_space<vmem>>) attributes {dimension_semantics = [#tpu.dimension_semantics<parallel>], iteration_bounds = array<i64: 1>, scalar_prefetch = 0 : i64, scratch_operands = 0 : i64, tpu.core_type = #tpu.core_type<tc>, window_params = [{transform_indices = @transform_0, window_bounds = array<i64: 8, 16>}, {pipeline_mode = #tpu.pipeline_mode<synchronous>, transform_indices = @transform_1, window_bounds = array<i64: 16, 64>}, {pipeline_mode = #tpu.pipeline_mode<synchronous>, transform_indices = @transform_2, window_bounds = array<i64: 1, 64>}, {pipeline_mode = #tpu.pipeline_mode<synchronous>, transform_indices = @transform_3, window_bounds = array<i64: 64, 128>}, {pipeline_mode = #tpu.pipeline_mode<synchronous>, transform_indices = @transform_4, window_bounds = array<i64: 1, 128>}, {pipeline_mode = #tpu.pipeline_mode<synchronous>, transform_indices = @transform_5, window_bounds = array<i64: 128, 256>}, {pipeline_mode = #tpu.pipeline_mode<synchronous>, transform_indices = @transform_6, window_bounds = array<i64: 1, 256>}, {pipeline_mode = #tpu.pipeline_mode<synchronous>, transform_indices = @transform_7, window_bounds = array<i64: 256, 128>}, {pipeline_mode = #tpu.pipeline_mode<synchronous>, transform_indices = @transform_8, window_bounds = array<i64: 1, 128>}, {pipeline_mode = #tpu.pipeline_mode<synchronous>, transform_indices = @transform_9, window_bounds = array<i64: 128, 64>}, {pipeline_mode = #tpu.pipeline_mode<synchronous>, transform_indices = @transform_10, window_bounds = array<i64: 1, 64>}, {pipeline_mode = #tpu.pipeline_mode<synchronous>, transform_indices = @transform_11, window_bounds = array<i64: 64, 128>}, {pipeline_mode = #tpu.pipeline_mode<synchronous>, transform_indices = @transform_12, window_bounds = array<i64: 1, 128>}, {transform_indices = @transform_13, window_bounds = array<i64: 8, 128>}]} {
    %c0 = arith.constant 0 : index
    %c0_0 = arith.constant 0 : index
    %0 = vector.load %arg1[%c0, %c0_0] : memref<8x16xbf16, #tpu.memory_space<vmem>>, vector<8x16xbf16>
    %c0_1 = arith.constant 0 : index
    %c0_2 = arith.constant 0 : index
    %1 = vector.load %arg2[%c0_1, %c0_2] : memref<16x64xbf16, #tpu.memory_space<vmem>>, vector<16x64xbf16>
    %cst = arith.constant dense<0.000000e+00> : vector<8x64xf32>
    %2 = tpu.matmul %0, %1, %cst {dimension_numbers = #tpu.dot_dimension_numbers<[1], [0], [0], [1], [0, 0, 1, 1], [], []>} : vector<8x16xbf16>, vector<16x64xbf16>, vector<8x64xf32> -> vector<8x64xf32>
    %c0_3 = arith.constant 0 : index
    %c0_4 = arith.constant 0 : index
    %3 = vector.load %arg3[%c0_3, %c0_4] : memref<1x64xf32, #tpu.memory_space<vmem>>, vector<1x64xf32>
    %4 = vector.broadcast %3 : vector<1x64xf32> to vector<8x64xf32>
    %5 = arith.addf %2, %4 : vector<8x64xf32>
    %cst_5 = arith.constant 0.000000e+00 : f32
    %6 = vector.broadcast %cst_5 : f32 to vector<8x64xf32>
    %7 = arith.maximumf %5, %6 : vector<8x64xf32>
    %8 = arith.truncf %7 : vector<8x64xf32> to vector<8x64xbf16>
    %c0_6 = arith.constant 0 : index
    %c0_7 = arith.constant 0 : index
    %9 = vector.load %arg4[%c0_6, %c0_7] : memref<64x128xbf16, #tpu.memory_space<vmem>>, vector<64x128xbf16>
    %cst_8 = arith.constant dense<0.000000e+00> : vector<8x128xf32>
    %10 = tpu.matmul %8, %9, %cst_8 {dimension_numbers = #tpu.dot_dimension_numbers<[1], [0], [0], [1], [0, 0, 1, 1], [], []>} : vector<8x64xbf16>, vector<64x128xbf16>, vector<8x128xf32> -> vector<8x128xf32>
    %c0_9 = arith.constant 0 : index
    %c0_10 = arith.constant 0 : index
    %11 = vector.load %arg5[%c0_9, %c0_10] : memref<1x128xf32, #tpu.memory_space<vmem>>, vector<1x128xf32>
    %12 = vector.broadcast %11 : vector<1x128xf32> to vector<8x128xf32>
    %13 = arith.addf %10, %12 : vector<8x128xf32>
    %cst_11 = arith.constant 0.000000e+00 : f32
    %14 = vector.broadcast %cst_11 : f32 to vector<8x128xf32>
    %15 = arith.maximumf %13, %14 : vector<8x128xf32>
    %16 = arith.truncf %15 : vector<8x128xf32> to vector<8x128xbf16>
    %c0_12 = arith.constant 0 : index
    %c0_13 = arith.constant 0 : index
    %17 = vector.load %arg6[%c0_12, %c0_13] : memref<128x256xbf16, #tpu.memory_space<vmem>>, vector<128x256xbf16>
    %cst_14 = arith.constant dense<0.000000e+00> : vector<8x256xf32>
    %18 = tpu.matmul %16, %17, %cst_14 {dimension_numbers = #tpu.dot_dimension_numbers<[1], [0], [0], [1], [0, 0, 1, 1], [], []>} : vector<8x128xbf16>, vector<128x256xbf16>, vector<8x256xf32> -> vector<8x256xf32>
    %c0_15 = arith.constant 0 : index
    %c0_16 = arith.constant 0 : index
    %19 = vector.load %arg7[%c0_15, %c0_16] : memref<1x256xf32, #tpu.memory_space<vmem>>, vector<1x256xf32>
    %20 = vector.broadcast %19 : vector<1x256xf32> to vector<8x256xf32>
    %21 = arith.addf %18, %20 : vector<8x256xf32>
    %cst_17 = arith.constant 0.000000e+00 : f32
    %22 = vector.broadcast %cst_17 : f32 to vector<8x256xf32>
    %23 = arith.maximumf %21, %22 : vector<8x256xf32>
    %24 = arith.truncf %23 : vector<8x256xf32> to vector<8x256xbf16>
    %c0_18 = arith.constant 0 : index
    %c0_19 = arith.constant 0 : index
    %25 = vector.load %arg8[%c0_18, %c0_19] : memref<256x128xbf16, #tpu.memory_space<vmem>>, vector<256x128xbf16>
    %cst_20 = arith.constant dense<0.000000e+00> : vector<8x128xf32>
    %26 = tpu.matmul %24, %25, %cst_20 {dimension_numbers = #tpu.dot_dimension_numbers<[1], [0], [0], [1], [0, 0, 1, 1], [], []>} : vector<8x256xbf16>, vector<256x128xbf16>, vector<8x128xf32> -> vector<8x128xf32>
    %c0_21 = arith.constant 0 : index
    %c0_22 = arith.constant 0 : index
    %27 = vector.load %arg9[%c0_21, %c0_22] : memref<1x128xf32, #tpu.memory_space<vmem>>, vector<1x128xf32>
    %28 = vector.broadcast %27 : vector<1x128xf32> to vector<8x128xf32>
    %29 = arith.addf %26, %28 : vector<8x128xf32>
    %cst_23 = arith.constant 0.000000e+00 : f32
    %30 = vector.broadcast %cst_23 : f32 to vector<8x128xf32>
    %31 = arith.maximumf %29, %30 : vector<8x128xf32>
    %32 = arith.truncf %31 : vector<8x128xf32> to vector<8x128xbf16>
    %c0_24 = arith.constant 0 : index
    %c0_25 = arith.constant 0 : index
    %33 = vector.load %arg10[%c0_24, %c0_25] : memref<128x64xbf16, #tpu.memory_space<vmem>>, vector<128x64xbf16>
    %cst_26 = arith.constant dense<0.000000e+00> : vector<8x64xf32>
    %34 = tpu.matmul %32, %33, %cst_26 {dimension_numbers = #tpu.dot_dimension_numbers<[1], [0], [0], [1], [0, 0, 1, 1], [], []>} : vector<8x128xbf16>, vector<128x64xbf16>, vector<8x64xf32> -> vector<8x64xf32>
    %c0_27 = arith.constant 0 : index
    %c0_28 = arith.constant 0 : index
    %35 = vector.load %arg11[%c0_27, %c0_28] : memref<1x64xf32, #tpu.memory_space<vmem>>, vector<1x64xf32>
    %36 = vector.broadcast %35 : vector<1x64xf32> to vector<8x64xf32>
    %37 = arith.addf %34, %36 : vector<8x64xf32>
    %cst_29 = arith.constant 0.000000e+00 : f32
    %38 = vector.broadcast %cst_29 : f32 to vector<8x64xf32>
    %39 = arith.maximumf %37, %38 : vector<8x64xf32>
    %40 = arith.truncf %39 : vector<8x64xf32> to vector<8x64xbf16>
    %c0_30 = arith.constant 0 : index
    %c0_31 = arith.constant 0 : index
    %41 = vector.load %arg12[%c0_30, %c0_31] : memref<64x128xbf16, #tpu.memory_space<vmem>>, vector<64x128xbf16>
    %cst_32 = arith.constant dense<0.000000e+00> : vector<8x128xf32>
    %42 = tpu.matmul %40, %41, %cst_32 {dimension_numbers = #tpu.dot_dimension_numbers<[1], [0], [0], [1], [0, 0, 1, 1], [], []>} : vector<8x64xbf16>, vector<64x128xbf16>, vector<8x128xf32> -> vector<8x128xf32>
    %c0_33 = arith.constant 0 : index
    %c0_34 = arith.constant 0 : index
    %43 = vector.load %arg13[%c0_33, %c0_34] : memref<1x128xf32, #tpu.memory_space<vmem>>, vector<1x128xf32>
    %44 = vector.broadcast %43 : vector<1x128xf32> to vector<8x128xf32>
    %45 = arith.addf %42, %44 : vector<8x128xf32>
    %c0_35 = arith.constant 0 : index
    %c0_36 = arith.constant 0 : index
    %46 = vector.load %arg14[%c0_35, %c0_36] : memref<8x128xf32, #tpu.memory_space<vmem>>, vector<8x128xf32>
    tpu.vector_store %arg14[%c0_35, %c0_36], %45 {strides = array<i32>} : memref<8x128xf32, #tpu.memory_space<vmem>>, vector<8x128xf32>,
    return
  }
  func.func @transform_0(%arg0: i32) -> (i32, i32) {
    %c0_i32 = arith.constant 0 : i32
    %c0_i32_0 = arith.constant 0 : i32
    return %arg0, %c0_i32 : i32, i32
  }
  func.func @transform_1(%arg0: i32) -> (i32, i32) {
    %c0_i32 = arith.constant 0 : i32
    %c0_i32_0 = arith.constant 0 : i32
    %c0_i32_1 = arith.constant 0 : i32
    return %c0_i32, %c0_i32_0 : i32, i32
  }
  func.func @transform_2(%arg0: i32) -> (i32, i32) {
    %c0_i32 = arith.constant 0 : i32
    %c0_i32_0 = arith.constant 0 : i32
    %c0_i32_1 = arith.constant 0 : i32
    return %c0_i32, %c0_i32_0 : i32, i32
  }
  func.func @transform_3(%arg0: i32) -> (i32, i32) {
    %c0_i32 = arith.constant 0 : i32
    %c0_i32_0 = arith.constant 0 : i32
    %c0_i32_1 = arith.constant 0 : i32
    return %c0_i32, %c0_i32_0 : i32, i32
  }
  func.func @transform_4(%arg0: i32) -> (i32, i32) {
    %c0_i32 = arith.constant 0 : i32
    %c0_i32_0 = arith.constant 0 : i32
    %c0_i32_1 = arith.constant 0 : i32
    return %c0_i32, %c0_i32_0 : i32, i32
  }
  func.func @transform_5(%arg0: i32) -> (i32, i32) {
    %c0_i32 = arith.constant 0 : i32
    %c0_i32_0 = arith.constant 0 : i32
    %c0_i32_1 = arith.constant 0 : i32
    return %c0_i32, %c0_i32_0 : i32, i32
  }
  func.func @transform_6(%arg0: i32) -> (i32, i32) {
    %c0_i32 = arith.constant 0 : i32
    %c0_i32_0 = arith.constant 0 : i32
    %c0_i32_1 = arith.constant 0 : i32
    return %c0_i32, %c0_i32_0 : i32, i32
  }
  func.func @transform_7(%arg0: i32) -> (i32, i32) {
    %c0_i32 = arith.constant 0 : i32
    %c0_i32_0 = arith.constant 0 : i32
    %c0_i32_1 = arith.constant 0 : i32
    return %c0_i32, %c0_i32_0 : i32, i32
  }
  func.func @transform_8(%arg0: i32) -> (i32, i32) {
    %c0_i32 = arith.constant 0 : i32
    %c0_i32_0 = arith.constant 0 : i32
    %c0_i32_1 = arith.constant 0 : i32
    return %c0_i32, %c0_i32_0 : i32, i32
  }
  func.func @transform_9(%arg0: i32) -> (i32, i32) {
    %c0_i32 = arith.constant 0 : i32
    %c0_i32_0 = arith.constant 0 : i32
    %c0_i32_1 = arith.constant 0 : i32
    return %c0_i32, %c0_i32_0 : i32, i32
  }
  func.func @transform_10(%arg0: i32) -> (i32, i32) {
    %c0_i32 = arith.constant 0 : i32
    %c0_i32_0 = arith.constant 0 : i32
    %c0_i32_1 = arith.constant 0 : i32
    return %c0_i32, %c0_i32_0 : i32, i32
  }
  func.func @transform_11(%arg0: i32) -> (i32, i32) {
    %c0_i32 = arith.constant 0 : i32
    %c0_i32_0 = arith.constant 0 : i32
    %c0_i32_1 = arith.constant 0 : i32
    return %c0_i32, %c0_i32_0 : i32, i32
  }
  func.func @transform_12(%arg0: i32) -> (i32, i32) {
    %c0_i32 = arith.constant 0 : i32
    %c0_i32_0 = arith.constant 0 : i32
    %c0_i32_1 = arith.constant 0 : i32
    return %c0_i32, %c0_i32_0 : i32, i32
  }
  func.func @transform_13(%arg0: i32) -> (i32, i32) {
    %c0_i32 = arith.constant 0 : i32
    %c0_i32_0 = arith.constant 0 : i32
    return %arg0, %c0_i32 : i32, i32
  }
}

</mosaic_0001>

<bundles_post_ra>
// kernel: tpu_custom_call.1
= control target key start
LH: loop header
LB: loop body
LE: loop exit
PB: predicated region body
PF: predicated region fallthrough
CT: control target
= control target key end

     0   :  { %18 = vsyncpa [#allocation3], 0  ;;  %s1267_s0 = inlined_call_operand.vmem [shape: bf16[8,16], index: 0, kind: input, shape index: {}]   ;;  %s1268_s1 = inlined_call_operand.vmem [shape: bf16[16,64], index: 1, kind: input, shape index: {}]   ;;  %s1269_s2 = inlined_call_operand.vmem [shape: f32[1,64], index: 2, kind: input, shape index: {}]   ;;  %s1270_s3 = inlined_call_operand.vmem [shape: bf16[64,128], index: 3, kind: input, shape index: {}]   ;;  %s1271_s4 = inlined_call_operand.vmem [shape: f32[1,128], index: 4, kind: input, shape index: {}]   ;;  %s1272_s5 = inlined_call_operand.hbm [shape: bf16[128,256], index: 5, kind: input, shape index: {}]   ;;  %s1273_s6 = inlined_call_operand.vmem [shape: f32[1,256], index: 6, kind: input, shape index: {}]   ;;  %s1274_s7 = inlined_call_operand.hbm [shape: bf16[256,128], index: 7, kind: input, shape index: {}]   ;;  %s1275_s8 = inlined_call_operand.vmem [shape: f32[1,128], index: 8, kind: input, shape index: {}]   ;;  %s1276_s9 = inlined_call_operand.vmem [shape: bf16[128,64], index: 9, kind: input, shape index: {}]   ;;  %s1277_s10 = inlined_call_operand.vmem [shape: f32[1,64], index: 10, kind: input, shape index: {}]   ;;  %s1278_s11 = inlined_call_operand.vmem [shape: bf16[64,128], index: 11, kind: input, shape index: {}]   ;;  %s1279_s12 = inlined_call_operand.vmem [shape: f32[1,128], index: 12, kind: input, shape index: {}]   ;;  %s1280_s13 = inlined_call_operand.hbm [shape: f32[8,128], index: 13, kind: output, shape index: {}]  }
   0x1   :  { %19 = vsyncpa [#allocation6], 0 }
   0x2   :  { %20 = vsyncpa [#allocation4], 0  ;;  %s1052_s25 = smov [#allocation2]   ;;  %s980_s29 = scalar_lea.hbm %s1272_s5, 2048 }
   0x3   :  { %s36_s26 = sshll.u32 %s1052_s25, 4  ;;  %p981_p0 = scmp.ne.s32.totalorder %s1272_s5, %s980_s29  ;;  %s37_s26 = int_to_ptr.vmem [resolvable:$true] %s36_s26 }
   0x4   :  { %p984_p1 = scmp.lt.u32.totalorder %s980_s29, %s1272_s5 }
   0x6   :  { %p986_p2 = pnand %p984_p1, %p981_p0 }
   0x8   :  { %989 = shalt.err (!%p986_p2)
}
   0x9   :  { %s990_s17 = scalar_lea.vmem %s37_s26, 2048  ;;  %p995_p4 = scmp.lt.s32.totalorder %s37_s26, %s37_s26 }
   0xa   :  { %p991_p3 = scmp.ne.s32.totalorder %s37_s26, %s990_s17  ;;  %p996_p5 = scmp.lt.s32.totalorder %s990_s17, %s990_s17 }
   0xc   :  { %p997_p6 = por %p996_p5, %p995_p4 }
   0xe   :  { %p998_p7 = pnand %p997_p6, %p991_p3 }
  0x10   :  { %1001 = shalt.err (!%p998_p7)
}
  0x11   :  { %s1053_s18 = smov 128   ;;  %s1054_s19 = smov 8  }
  0x12   :  { %42 = dma.hbm_to_vmem [thread:$0]  %s1272_s5, 2048, %s37_s26, [#allocation3], %s1053_s18, %s1053_s18, %s1054_s19  }
  0x13   :  { %s1055_s22 = smov [#allocation5]   ;;  %s1002_s27 = scalar_lea.hbm %s1274_s7, 2048 }
  0x14   :  { %s50_s23 = sshll.u32 %s1055_s22, 4  ;;  %p1003_p8 = scmp.ne.s32.totalorder %s1274_s7, %s1002_s27  ;;  %s51_s23 = int_to_ptr.vmem [resolvable:$true] %s50_s23 }
  0x15   :  { %p1006_p9 = scmp.lt.u32.totalorder %s1002_s27, %s1274_s7 }
  0x17   :  { %p1008_p10 = pnand %p1006_p9, %p1003_p8 }
  0x19   :  { %1011 = shalt.err (!%p1008_p10)
}
  0x1a   :  { %s1012_s15 = scalar_lea.vmem %s51_s23, 2048  ;;  %p1017_p12 = scmp.lt.s32.totalorder %s51_s23, %s51_s23 }
  0x1b   :  { %p1013_p11 = scmp.ne.s32.totalorder %s51_s23, %s1012_s15  ;;  %p1018_p13 = scmp.lt.s32.totalorder %s1012_s15, %s1012_s15 }
  0x1d   :  { %p1019_p0 = por %p1018_p13, %p1017_p12 }
  0x1f   :  { %p1020_p1 = pnand %p1019_p0, %p1013_p11 }
  0x21   :  { %1023 = shalt.err (!%p1020_p1)
}
  0x22   :  { %s1056_s5 = smov 64   ;;  %s1057_s26 = smov 4  }
  0x23   :  { %56 = dma.hbm_to_vmem [thread:$0]  %s1274_s7, 2048, %s51_s23, [#allocation6], %s1056_s5, %s1056_s5, %s1057_s26  }
  0x24   :  { %1046 = dma.done.wait [#allocation3], 2048  }
  0x25   :  { %1047 = vsyncadd [#allocation3], 4294965248 }
  0x26   :  { %1048 = dma.done.wait [#allocation6], 2048  }
  0x27   :  { %1049 = vsyncadd [#allocation6], 4294965248  ;;  %v1058_v0 = vmov 0.0   ;;  %vm1059_vm0 = vmmov 0   ;;  %v923_v1 = vld [vmem:[%s1268_s1] sm:$0xff]   ;;  %vm90_vm1 = vcmask 130048   ;;  %v239_v62 = vlaneseq }
  0x28   :  { %863 = vmatprep.subr.bf16.mxu0 %v1058_v0  ;;  %865 = vmatprep.mubr.msk.bf16.mxu0 %vm1059_vm0, %v1058_v0  ;;  %v74_v2 = vld [vmem:[%s1267_s0] sm:$0xf]  ;;  %v925_v4 = vld [vmem:[%s1270_s3 + $0x8] sm:$0xff]   ;;  %v926_v5 = vld [vmem:[%s1270_s3 + $0x10] sm:$0xff]   ;;  %vm175_vm2 = vcmask 523264   ;;  %v1060_v31 = vmov 0  }
  0x29   :  { %869 = vmatprep.subr.bf16.mxu1 %v1058_v0  ;;  %877 = vmatprep.mubr.msk.bf16.mxu1 %vm1059_vm0, %v1058_v0  ;;  %v924_v3 = vld [vmem:[%s1270_s3] sm:$0xff]   ;;  %v927_v6 = vld [vmem:[%s1270_s3 + $0x18] sm:$0xff]   ;;  %v954_v34 = vld [vmem:[#allocation5 + $0x48] sm:$0xff]   ;;  %v240_v63 = vshrl.u32 %v239_v62, 7  ;;  %s1061_s26 = smov [#allocation7]  }
  0x2a   :  { %864 = vmatpush3.bf16.msra.mxu0 %v923_v1  ;;  %870 = vmatpush3.bf16.msra.mxu1 %v924_v3  ;;  %v928_v7 = vld [vmem:[#allocation2] ss:$8 sps:$4 sm:$0xff]   ;;  %v930_v8 = vld [vmem:[#allocation2 + $0x4] ss:$8 sps:$4 sm:$0xff]   ;;  %v933_v9 = vld [vmem:[#allocation2 + $0x14] ss:$8 sps:$4 sm:$0xff]  }
  0x2b   :  { %871 = vmatprep.subr.bf16.mxu1 %v1058_v0  ;;  %329 = vmatprep.subr.bf16.mxu0 %v930_v8  ;;  %v931_v10 = vld [vmem:[#allocation2 + $0x10] ss:$8 sps:$4 sm:$0xff]   ;;  %v936_v11 = vld [vmem:[#allocation2 + $0x24] ss:$8 sps:$4 sm:$0xff]   ;;  %v934_v12 = vld [vmem:[#allocation2 + $0x20] ss:$8 sps:$4 sm:$0xff]  }
  0x2c   :  { %v939_v13 = vld [vmem:[#allocation2 + $0x34] ss:$8 sps:$4 sm:$0xff]   ;;  %v937_v14 = vld [vmem:[#allocation2 + $0x30] ss:$8 sps:$4 sm:$0xff]   ;;  %v942_v15 = vld [vmem:[#allocation2 + $0x44] ss:$8 sps:$4 sm:$0xff]  }
  0x2d   :  { %866 = vmatmul.mubr.msk.bf16.vlgmr.msra.gmra.mrb[0].mxu0 %vm90_vm1, %v74_v2  ;;  %v940_v16 = vld [vmem:[#allocation2 + $0x40] ss:$8 sps:$4 sm:$0xff]   ;;  %v945_v17 = vld [vmem:[#allocation2 + $0x54] ss:$8 sps:$4 sm:$0xff]   ;;  %v943_v18 = vld [vmem:[#allocation2 + $0x50] ss:$8 sps:$4 sm:$0xff]  }
  0x2e   :  { %872 = vmatpush3.bf16.msra.mxu1 %v925_v4  ;;  %330 = vmatpush1.bf16.msra.mxu0 %v928_v7  ;;  %v948_v19 = vld [vmem:[#allocation2 + $0x64] ss:$8 sps:$4 sm:$0xff]   ;;  %v946_v20 = vld [vmem:[#allocation2 + $0x60] ss:$8 sps:$4 sm:$0xff]   ;;  %v951_v29 = vld [vmem:[#allocation2 + $0x74] ss:$8 sps:$4 sm:$0xff]  }
  0x2f   :  { %873 = vmatprep.subr.bf16.mxu1 %v1058_v0  ;;  %331 = vmatprep.subr.bf16.mxu0 %v933_v9  ;;  %v763_v21 = vld [vmem:[%s1269_s2] ss:$0 sm:$0xff]  ;;  %v949_v30 = vld [vmem:[#allocation2 + $0x70] ss:$8 sps:$4 sm:$0xff]   ;;  %v955_v35 = vld [vmem:[#allocation5 + $0x8] sm:$0xff]   ;;  %v241_v1 = vsub.s32 0, %v240_v63 }
  0x30   :  { %361 = vmatprep.mubr.bf16.mxu0 %v1060_v31  ;;  %v952_v32 = vld [vmem:[#allocation5 + $0x40] sm:$0xff]   ;;  %v956_v36 = vld [vmem:[#allocation5 + $0x50] sm:$0xff]   ;;  %v958_v38 = vld [vmem:[#allocation5 + $0x58] sm:$0xff]   ;;  %v245_v3 = vsub.s32 1, %v240_v63 }
  0x31   :  { %v953_v33 = vld [vmem:[#allocation5] sm:$0xff]   ;;  %v957_v37 = vld [vmem:[#allocation5 + $0x10] sm:$0xff]   ;;  %v959_v39 = vld [vmem:[#allocation5 + $0x18] sm:$0xff]  }
  0x32   :  { %874 = vmatpush3.bf16.msra.mxu1 %v926_v5  ;;  %332 = vmatpush1.bf16.msra.mxu0 %v931_v10  ;;  %v960_v40 = vld [vmem:[#allocation5 + $0x60] sm:$0xff]   ;;  %v962_v42 = vld [vmem:[#allocation5 + $0x68] sm:$0xff]   ;;  %v964_v52 = vld [vmem:[#allocation5 + $0x70] sm:$0xff]  }
  0x33   :  { %875 = vmatprep.subr.bf16.mxu1 %v1058_v0  ;;  %333 = vmatprep.subr.bf16.mxu0 %v936_v11  ;;  %v961_v41 = vld [vmem:[#allocation5 + $0x20] sm:$0xff]   ;;  %v963_v43 = vld [vmem:[#allocation5 + $0x28] sm:$0xff]   ;;  %v965_v53 = vld [vmem:[#allocation5 + $0x30] sm:$0xff]  }
  0x34   :  { %v766_v44 = vld [vmem:[%s1271_s4] ss:$0 sm:$0xff]  ;;  %v966_v54 = vld [vmem:[#allocation5 + $0x78] sm:$0xff]   ;;  %v969_v57 = vld [vmem:[%s1276_s9 + $0x8] sm:$0xff]  }
  0x35   :  { %v967_v55 = vld [vmem:[#allocation5 + $0x38] sm:$0xff]   ;;  %v968_v56 = vld [vmem:[%s1276_s9] sm:$0xff]   ;;  %v970_v58 = vld [vmem:[%s1276_s9 + $0x10] sm:$0xff]  }
  0x36   :  { %876 = vmatpush3.bf16.msra.mxu1 %v927_v6  ;;  %334 = vmatpush1.bf16.msra.mxu0 %v934_v12  ;;  %v971_v59 = vld [vmem:[%s1276_s9 + $0x18] sm:$0xff]   ;;  %v972_v60 = vld [vmem:[%s1276_s9 + $0x20] sm:$0xff]   ;;  %v973_v61 = vld [vmem:[%s1276_s9 + $0x28] sm:$0xff]  }
  0x37   :  { %335 = vmatprep.subr.bf16.mxu0 %v939_v13  ;;  %827 = vmatprep.subr.bf16.mxu1 %v952_v32  ;;  %v237_v2 = vld [vmem:[%s1273_s6] sm:$0x3] }
  0x38   :  { %v242_v4 = vrot.slane %v237_v2, %v241_v1  ;;  %v246_v5 = vrot.slane %v237_v2, %v245_v3  ;;  %v805_v31 = vld [vmem:[%s1277_s10] ss:$0 sm:$0xff] }
  0x3a   :  { %336 = vmatpush1.bf16.msra.mxu0 %v937_v14 }
  0x3b   :  { %337 = vmatprep.subr.bf16.mxu0 %v942_v15 }
  0x3e   :  { %338 = vmatpush1.bf16.msra.mxu0 %v940_v16  ;;  %v974_v16 = vld [vmem:[%s1276_s9 + $0x30] sm:$0xff]  }
  0x3f   :  { %339 = vmatprep.subr.bf16.mxu0 %v945_v17  ;;  %v975_v17 = vld [vmem:[%s1276_s9 + $0x38] sm:$0xff]  }
  0x42   :  { %340 = vmatpush1.bf16.msra.mxu0 %v943_v18  ;;  %v976_v18 = vld [vmem:[%s1278_s11] sm:$0xff]  }
  0x43   :  { %341 = vmatprep.subr.bf16.mxu0 %v948_v19  ;;  %v977_v19 = vld [vmem:[%s1278_s11 + $0x8] sm:$0xff]  }
  0x46   :  { %342 = vmatpush1.bf16.msra.mxu0 %v946_v20 }
  0x47   :  { %343 = vmatprep.subr.bf16.mxu0 %v951_v29  ;;  %v978_v29 = vld [vmem:[%s1278_s11 + $0x10] sm:$0xff]  }
  0x4a   :  { %344 = vmatpush1.bf16.msra.mxu0 %v949_v30  ;;  %v979_v30 = vld [vmem:[%s1278_s11 + $0x18] sm:$0xff]   ;;  %s753_s11 = sshll.u32 %s1061_s26, 4  ;;  %s754_s11 = int_to_ptr.vmem [resolvable:$true] %s753_s11 }
  0x4b   :  { %881 = vmatprep.subr.bf16.mxu0 %v1058_v0  ;;  %s1024_s10 = scalar_lea.vmem %s754_s11, 128  ;;  %p1029_p3 = scmp.lt.s32.totalorder %s754_s11, %s754_s11 }
  0x4c   :  { %p1025_p2 = scmp.ne.s32.totalorder %s754_s11, %s1024_s10  ;;  %p1030_p4 = scmp.lt.s32.totalorder %s1024_s10, %s1024_s10 }
  0x4e   :  { %p1031_p5 = por %p1030_p4, %p1029_p3 }
  0x50   :  { %p1032_p6 = pnand %p1031_p5, %p1025_p2 }
 0x100   :  { %v128_v22 = vpop.f32.mrb[0].mxu0 }
 0x101   :  { %v129_v23 = vadd.f32 %v763_v21, %v128_v22  ;;  %v867_v24 = vpop.f32.mrb[1].mxu0  ;;  %v788_v21 = vld [vmem:[%s1275_s8] ss:$0 sm:$0xff] }
 0x102   :  { %v131_v25 = vpop.f32.mrb[2].mxu0 }
 0x103   :  { %v134_v26 = vmax.f32 %v129_v23, 0.0  ;;  %v868_v27 = vpop.f32.mrb[3].mxu0 }
 0x105   :  { %v135_v28 = vpack.c.bf16 %v134_v26, %v134_v26 }
 0x107   :  { %878 = vmatmul.mubr.msk.bf16.vlgmr.msra.gmra.mrb[0].mxu1 %vm175_vm2, %v135_v28 }
 0x108   :  { %828 = vmatpush3.bf16.msra.mxu1 %v953_v33 }
 0x109   :  { %829 = vmatprep.subr.bf16.mxu1 %v954_v34 }
 0x10c   :  { %830 = vmatpush3.bf16.msra.mxu1 %v955_v35 }
 0x10d   :  { %831 = vmatprep.subr.bf16.mxu1 %v956_v36 }
 0x110   :  { %832 = vmatpush3.bf16.msra.mxu1 %v957_v37 }
 0x111   :  { %833 = vmatprep.subr.bf16.mxu1 %v958_v38 }
 0x114   :  { %834 = vmatpush3.bf16.msra.mxu1 %v959_v39 }
 0x115   :  { %835 = vmatprep.subr.bf16.mxu1 %v960_v40 }
 0x118   :  { %836 = vmatpush3.bf16.msra.mxu1 %v961_v41 }
 0x119   :  { %837 = vmatprep.subr.bf16.mxu1 %v962_v42 }
 0x11c   :  { %838 = vmatpush3.bf16.msra.mxu1 %v963_v43 }
 0x11d   :  { %839 = vmatprep.subr.bf16.mxu1 %v964_v52 }
 0x120   :  { %840 = vmatpush3.bf16.msra.mxu1 %v965_v53 }
 0x121   :  { %841 = vmatprep.subr.bf16.mxu1 %v966_v54 }
 0x124   :  { %842 = vmatpush3.bf16.msra.mxu1 %v967_v55 }
 0x125   :  { %901 = vmatprep.subr.bf16.mxu1 %v1058_v0 }
 0x1da   :  { %v213_v45 = vpop.f32.mrb[0].mxu1 }
 0x1db   :  { %v214_v46 = vadd.f32 %v766_v44, %v213_v45  ;;  %v879_v47 = vpop.f32.mrb[1].mxu1 }
 0x1dc   :  { %v216_v48 = vpop.f32.mrb[2].mxu1 }
 0x1dd   :  { %v219_v49 = vmax.f32 %v214_v46, 0.0  ;;  %v880_v50 = vpop.f32.mrb[3].mxu1 }
 0x1df   :  { %v220_v51 = vpack.c.bf16 %v219_v49, %v219_v49 }
 0x1e1   :  { %362 = vmatmul.mubr.bf16.vlgmr.msra.gmra.mrb[4].mxu0 %v220_v51 }
 0x1e2   :  { %897 = vmatprep.mubr.msk.bf16.mxu0 %vm1059_vm0, %v1058_v0  ;;  %882 = vmatpush3.bf16.msra.mxu0 %v968_v56 }
 0x1e3   :  { %883 = vmatprep.subr.bf16.mxu0 %v1058_v0 }
 0x1e6   :  { %884 = vmatpush3.bf16.msra.mxu0 %v969_v57 }
 0x1e7   :  { %885 = vmatprep.subr.bf16.mxu0 %v1058_v0 }
 0x1ea   :  { %886 = vmatpush3.bf16.msra.mxu0 %v970_v58 }
 0x1eb   :  { %887 = vmatprep.subr.bf16.mxu0 %v1058_v0 }
 0x1ee   :  { %888 = vmatpush3.bf16.msra.mxu0 %v971_v59 }
 0x1ef   :  { %889 = vmatprep.subr.bf16.mxu0 %v1058_v0 }
 0x1f2   :  { %890 = vmatpush3.bf16.msra.mxu0 %v972_v60 }
 0x1f3   :  { %891 = vmatprep.subr.bf16.mxu0 %v1058_v0 }
 0x1f6   :  { %892 = vmatpush3.bf16.msra.mxu0 %v973_v61 }
 0x1f7   :  { %893 = vmatprep.subr.bf16.mxu0 %v1058_v0 }
 0x1fa   :  { %894 = vmatpush3.bf16.msra.mxu0 %v974_v16 }
 0x1fb   :  { %895 = vmatprep.subr.bf16.mxu0 %v1058_v0 }
 0x1fe   :  { %896 = vmatpush3.bf16.msra.mxu0 %v975_v17 }
 0x2b4   :  { %v363_v6 = vpop.f32.mrb[4].mxu0 }
 0x2b5   :  { %v364_v7 = vadd.f32 %v363_v6, %v242_v4  ;;  %v365_v8 = vpop.f32.mrb[5].mxu0 }
 0x2b6   :  { %v366_v9 = vadd.f32 %v365_v8, %v246_v5  ;;  %v367_v10 = vpop.f32.mrb[6].mxu0 }
 0x2b7   :  { %v370_v11 = vmax.f32 %v364_v7, 0.0  ;;  %v368_v12 = vpop.f32.mrb[7].mxu0 }
 0x2b8   :  { %v371_v13 = vmax.f32 %v366_v9, 0.0 }
 0x2b9   :  { %v372_v15 = vpack.c.bf16 %v370_v11, %v370_v11 }
 0x2ba   :  { %v373_v14 = vpack.c.bf16 %v371_v13, %v371_v13 }
 0x2bc   :  { %541 = vmatprep.mubr.bf16.mxu1 %v373_v14 }
 0x2bd   :  { %542 = vmatmul.mubr.bf16.vlgmr.msra.gmra.mrb[4].mxu1 %v372_v15 }
 0x2be   :  { %909 = vmatprep.mubr.msk.bf16.mxu1 %vm1059_vm0, %v1058_v0  ;;  %902 = vmatpush3.bf16.msra.mxu1 %v976_v18 }
 0x2bf   :  { %903 = vmatprep.subr.bf16.mxu1 %v1058_v0 }
 0x2c2   :  { %904 = vmatpush3.bf16.msra.mxu1 %v977_v19 }
 0x2c3   :  { %905 = vmatprep.subr.bf16.mxu1 %v1058_v0 }
 0x2c6   :  { %906 = vmatpush3.bf16.msra.mxu1 %v978_v29 }
 0x2c7   :  { %907 = vmatprep.subr.bf16.mxu1 %v1058_v0  ;;  %v814_v0 = vld [vmem:[%s1279_s12] ss:$0 sm:$0xff] }
 0x2ca   :  { %908 = vmatpush3.bf16.msra.mxu1 %v979_v30 }
 0x390   :  { %v843_v20 = vpop.f32.mrb[4].mxu1 }
 0x391   :  { %v844_v22 = vpop.f32.mrb[5].mxu1 }
 0x392   :  { %v845_v23 = vadd.f32 %v844_v22, %v843_v20  ;;  %v846_v24 = vpop.f32.mrb[6].mxu1 }
 0x393   :  { %v847_v25 = vpop.f32.mrb[7].mxu1 }
 0x394   :  { %v544_v26 = vadd.f32 %v845_v23, %v788_v21 }
 0x396   :  { %v549_v27 = vmax.f32 %v544_v26, 0.0 }
 0x398   :  { %v550_v28 = vpack.c.bf16 %v549_v27, %v549_v27 }
 0x39a   :  { %898 = vmatmul.mubr.bf16.vlgmr.msra.gmra.mrb[8].mxu0 %v550_v28 }
 0x46d   :  { %v656_v32 = vpop.f32.mrb[8].mxu0 }
 0x46e   :  { %v657_v33 = vadd.f32 %v805_v31, %v656_v32  ;;  %v899_v34 = vpop.f32.mrb[9].mxu0 }
 0x46f   :  { %v659_v35 = vpop.f32.mrb[10].mxu0 }
 0x470   :  { %v662_v36 = vmax.f32 %v657_v33, 0.0  ;;  %v900_v37 = vpop.f32.mrb[11].mxu0 }
 0x472   :  { %v663_v38 = vpack.c.bf16 %v662_v36, %v662_v36 }
 0x474   :  { %910 = vmatmul.mubr.msk.bf16.vlgmr.msra.gmra.mrb[8].mxu1 %vm175_vm2, %v663_v38 }
 0x547   :  { %v740_v39 = vpop.f32.mrb[8].mxu1 }
 0x548   :  { %v741_v40 = vadd.f32 %v814_v0, %v740_v39  ;;  %v911_v41 = vpop.f32.mrb[9].mxu1 }
 0x549   :  { %v743_v42 = vpop.f32.mrb[10].mxu1 }
 0x54a   :  { %746 = vst [vmem:[#allocation7] sm:$0xff] %v741_v40  ;;  %v912_v43 = vpop.f32.mrb[11].mxu1 }
 0x54b   :  { %1035 = shalt.err (!%p1032_p6)
}
 0x54c   :  { %s1036_s12 = scalar_lea.hbm %s1280_s13, 128 }
 0x54d   :  { %p1037_p7 = scmp.ne.s32.totalorder %s1280_s13, %s1036_s12  ;;  %p1040_p8 = scmp.lt.u32.totalorder %s1036_s12, %s1280_s13 }
 0x54f   :  { %p1042_p9 = pnand %p1040_p8, %p1037_p7 }
 0x551   :  { %1045 = shalt.err (!%p1042_p9)
}
 0x552   :  { %756 = dma.vmem_to_hbm [thread:$0]  %s754_s11, 128, %s1280_s13, [#allocation4]  }
 0x553   :  { %1050 = dma.done.wait [#allocation4], 128  }
 0x554   :  { %1051 = vsyncadd [#allocation4], 4294967168 }
 0x555   :  { %760 = vsyncpa [#allocation3], 1 }
 0x556   :  { %761 = vsyncpa [#allocation6], 1 }
 0x557   :  { %762 = vsyncpa [#allocation4], 1 }

</bundles_post_ra>
